<compile_context>
chip_gen: v5e
topology: v5e:2x2
jax: 0.10.0
libtpu: 0.0.40
codegen_flags: <defaults>
</compile_context>

<pallas_src>
import functools

import jax
import jax.numpy as jnp
from jax.experimental import pallas as pl
from jax.experimental.pallas import tpu as pltpu


# Conservative, generation-safe VMEM sizing (v5e/v6e: 128 MiB, v7x: 64 MiB per core).
_VMEM_LIMIT_BYTES = 48 * 1024 * 1024    # requested scoped VMEM limit (safe on v7x)
_WORKING_SET_BYTES = 24 * 1024 * 1024   # budget for the pipelined input working set


def _round_up(v, m):
    return ((v + m - 1) // m) * m


def _prod(xs):
    out = 1
    for s in xs:
        out *= int(s)
    return out


# --------------------------- kernels: reduce over sublanes ---------------------------
# Layout (P, R, Q); block (1 [squeezed], R, tile_q); reduce axis 0 of the (R, Tq) tile.

def _mean_kernel_sublane(x_ref, y_ref, out_ref, acc_ref, *,
                         q_total, tile_q, inv_count, needs_mask):
    p = pl.program_id(0)
    q = pl.program_id(1)

    @pl.when(jnp.logical_and(p == 0, q == 0))
    def _init():
        acc_ref[...] = jnp.zeros_like(acc_ref)

    d = x_ref[...].astype(jnp.float32) - y_ref[...].astype(jnp.float32)   # (R, Tq)
    dist = jnp.sqrt(jnp.sum(d * d, axis=0, keepdims=True))                # (1, Tq)

    if needs_mask:
        last_q = pl.num_programs(1) - 1

        @pl.when(q != last_q)
        def _acc_full():
            acc_ref[...] += dist

        @pl.when(q == last_q)
        def _acc_masked():
            col = q * tile_q + jax.lax.broadcasted_iota(jnp.int32, dist.shape, 1)
            acc_ref[...] += jnp.where(col < q_total, dist, 0.0)
    else:
        acc_ref[...] += dist

    @pl.when(jnp.logical_and(p == pl.num_programs(0) - 1,
                             q == pl.num_programs(1) - 1))
    def _finalize():
        out_ref[...] = (jnp.sum(acc_ref[...], axis=1, keepdims=True)
                        * jnp.float32(inv_count))


def _vec_kernel_sublane(x_ref, y_ref, out_ref):
    d = x_ref[...].astype(jnp.float32) - y_ref[...].astype(jnp.float32)   # (R, Tq)
    out_ref[...] = jnp.sqrt(jnp.sum(d * d, axis=0, keepdims=True))        # (1, Tq)


# ----------------------------- kernels: reduce over lanes ----------------------------
# Layout (M, R) for trailing `dim`; block (tile_m, R); reduce axis 1 of the tile.

def _mean_kernel_lane(x_ref, y_ref, out_ref, acc_ref, *,
                      m_total, tile_m, inv_count, needs_mask):
    i = pl.program_id(0)

    @pl.when(i == 0)
    def _init():
        acc_ref[...] = jnp.zeros_like(acc_ref)

    d = x_ref[...].astype(jnp.float32) - y_ref[...].astype(jnp.float32)   # (Tm, R)
    dist = jnp.sqrt(jnp.sum(d * d, axis=1, keepdims=True))                # (Tm, 1)

    if needs_mask:
        last = pl.num_programs(0) - 1

        @pl.when(i != last)
        def _acc_full():
            acc_ref[...] += dist

        @pl.when(i == last)
        def _acc_masked():
            row = i * tile_m + jax.lax.broadcasted_iota(jnp.int32, dist.shape, 0)
            acc_ref[...] += jnp.where(row < m_total, dist, 0.0)
    else:
        acc_ref[...] += dist

    @pl.when(i == pl.num_programs(0) - 1)
    def _finalize():
        out_ref[...] = (jnp.sum(acc_ref[...], axis=0, keepdims=True)
                        * jnp.float32(inv_count))


def _vec_kernel_lane(x_ref, y_ref, out_ref):
    d = x_ref[...].astype(jnp.float32) - y_ref[...].astype(jnp.float32)   # (Tm, R)
    out_ref[...] = jnp.sqrt(jnp.sum(d * d, axis=1, keepdims=True))        # (Tm, 1)


# ------------------------------------ tile sizing ------------------------------------

def _lane_tile(r, q, wire_bytes, max_tile=None):
    """Lane-tile width for the (P, R, Q) layout (R on sublanes, Q on lanes)."""
    if q <= 128:
        return q
    r_pad = _round_up(max(r, 1), 8)                       # sublane padding is real cost
    # 2 inputs x 2 pipeline buffers in wire dtype + ~2 f32 compute temporaries.
    per_lane = 2 * 2 * r_pad * wire_bytes + 2 * r_pad * 4
    t = _WORKING_SET_BYTES // per_lane
    if max_tile is not None:
        t = min(t, max_tile)
    if t >= q:
        return q                                          # single full-extent tile
    return max(128, (t // 128) * 128)                     # blocked: multiple of 128


def _row_tile(r, m, wire_bytes, max_tile=None):
    """Row-tile height for the (M, R) layout (M on sublanes, R on lanes)."""
    if m <= 8:
        return m
    lanes_pad = _round_up(max(r, 1), 128)                 # lane padding is real cost
    per_row = 2 * 2 * lanes_pad * wire_bytes + 2 * lanes_pad * 4
    t = _WORKING_SET_BYTES // per_row
    if max_tile is not None:
        t = min(t, max_tile)
    if t >= m:
        return m
    return max(8, (t // 8) * 8)                           # blocked: multiple of 8


# -------------------------------------- wrapper --------------------------------------

def l2_distance(x, y, dim=0, if_mean=True, *, _max_tile=None):
    """Pallas TPU implementation of L2Distance.forward.

    Computes sqrt(sum((x - y)**2, dim)) and, if `if_mean`, its mean.
    `_max_tile` is a test/debug knob that caps the tile size (forces multi-tile
    grids and the partial-tile masking path).  Compute is f32; the result is cast
    to the promoted input dtype.
    """
    assert x.shape == y.shape, (x.shape, y.shape)
    ndim = x.ndim
    assert ndim >= 1
    dim = dim % ndim
    shape = tuple(int(s) for s in x.shape)
    r = shape[dim]
    rest_shape = shape[:dim] + shape[dim + 1:]
    out_dtype = jnp.promote_types(x.dtype, y.dtype)
    wire_bytes = max(jnp.dtype(x.dtype).itemsize, jnp.dtype(y.dtype).itemsize)
    compiler = functools.partial(pltpu.CompilerParams,
                                 vmem_limit_bytes=_VMEM_LIMIT_BYTES)

    if dim == ndim - 1:
        # ---- trailing axis: reduce along lanes; layout (M, R); no transpose ----
        m = _prod(rest_shape)
        x2 = x.reshape(m, r)
        y2 = y.reshape(m, r)
        tm = _row_tile(r, m, wire_bytes, _max_tile)
        n_tiles = pl.cdiv(m, tm)
        needs_mask = (m % tm) != 0

        in_specs = [pl.BlockSpec((tm, r), lambda i: (i, 0)),
                    pl.BlockSpec((tm, r), lambda i: (i, 0))]

        if if_mean:
            out = pl.pallas_call(
                functools.partial(_mean_kernel_lane, m_total=m, tile_m=tm,
                                  inv_count=1.0 / m, needs_mask=needs_mask),
                out_shape=jax.ShapeDtypeStruct((1, 1), jnp.float32),
                grid=(n_tiles,),
                in_specs=in_specs,
                out_specs=pl.BlockSpec((1, 1), lambda i: (0, 0)),
                scratch_shapes=[pltpu.VMEM((tm, 1), jnp.float32)],
                compiler_params=compiler(dimension_semantics=("arbitrary",)),
            )(x2, y2)
            return out[0, 0].astype(out_dtype)

        out = pl.pallas_call(
            _vec_kernel_lane,
            out_shape=jax.ShapeDtypeStruct((m, 1), jnp.float32),
            grid=(n_tiles,),
            in_specs=in_specs,
            out_specs=pl.BlockSpec((tm, 1), lambda i: (i, 0)),
            compiler_params=compiler(dimension_semantics=("parallel",)),
        )(x2, y2)
        return out.reshape(rest_shape).astype(out_dtype)

    # ---- leading / middle axis: reduce along sublanes; layout (P, R, Q); no transpose ----
    p_total = _prod(shape[:dim])
    q_total = _prod(shape[dim + 1:])
    x3 = x.reshape(p_total, r, q_total)
    y3 = y.reshape(p_total, r, q_total)
    t = _lane_tile(r, q_total, wire_bytes, _max_tile)
    n_q_tiles = pl.cdiv(q_total, t)
    needs_mask = (q_total % t) != 0

    # 3-deep input pipelining only when a large R forces small lane tiles.
    multi_buffer = (t < 512) and (n_q_tiles > 1)

    def _in_spec():
        if multi_buffer:
            return pl.BlockSpec((None, r, t), lambda pp, qq: (pp, 0, qq),
                                pipeline_mode=pl.Buffered(3))
        return pl.BlockSpec((None, r, t), lambda pp, qq: (pp, 0, qq))

    in_specs = [_in_spec(), _in_spec()]

    if if_mean:
        out = pl.pallas_call(
            functools.partial(_mean_kernel_sublane, q_total=q_total, tile_q=t,
                              inv_count=1.0 / (p_total * q_total),
                              needs_mask=needs_mask),
            out_shape=jax.ShapeDtypeStruct((1, 1), jnp.float32),
            grid=(p_total, n_q_tiles),
            in_specs=in_specs,
            out_specs=pl.BlockSpec((1, 1), lambda pp, qq: (0, 0)),
            scratch_shapes=[pltpu.VMEM((1, t), jnp.float32)],
            compiler_params=compiler(dimension_semantics=("arbitrary", "arbitrary")),
        )(x3, y3)
        return out[0, 0].astype(out_dtype)

    out = pl.pallas_call(
        _vec_kernel_sublane,
        out_shape=jax.ShapeDtypeStruct((p_total, 1, q_total), jnp.float32),
        grid=(p_total, n_q_tiles),
        in_specs=in_specs,
        out_specs=pl.BlockSpec((None, 1, t), lambda pp, qq: (pp, 0, qq)),
        compiler_params=compiler(dimension_semantics=("parallel", "parallel")),
    )(x3, y3)
    return out.reshape(rest_shape).astype(out_dtype)


if __name__ == "__main__":
    key = jax.random.PRNGKey(0)
    kx, ky = jax.random.split(key)

    shape = (2, 4, 16, 16)
    x = jax.random.normal(kx, shape, dtype=jnp.float32)
    y = jax.random.normal(ky, shape, dtype=jnp.float32)

    def ref_fn(dim, if_mean):
        d = jnp.sqrt(jnp.sum((x - y) ** 2, axis=dim))
        return jnp.mean(d) if if_mean else d

    checks = [
        # (dim, if_mean, max_tile); max_tile=None -> VMEM-budget tile size,
        # small max_tile values force multi-tile grids + last-tile masking.
        (0, True, None),
        (0, False, None),
        (0, True, 384),    # partial lane tile -> mask branch + Buffered(3) inputs
        (1, True, None),   # middle dim, P > 1 (no transpose)
        (1, False, None),
        (3, True, None),   # trailing dim -> lane-reduce variant (no transpose)
        (3, False, None),
        (3, True, 48),     # partial row tile -> mask branch (lane variant)
    ]
    for dim, if_mean, max_tile in checks:
        out = l2_distance(x, y, dim=dim, if_mean=if_mean, _max_tile=max_tile)
        out = jax.block_until_ready(out)
        ref = ref_fn(dim, if_mean)
        assert jnp.allclose(out, ref, atol=1e-5, rtol=1e-5), (dim, if_mean, max_tile, out, ref)

    print("KERNEL_OK")
</pallas_src>

<mosaic_0001>
module attributes {stable_mosaic.version = 11 : i64} {
  func.func @_mean_kernel_sublane(%arg0: i32, %arg1: i32, %arg2: memref<1x2x1024xf32, #tpu.memory_space<vmem>>, %arg3: memref<1x2x1024xf32, #tpu.memory_space<vmem>>, %arg4: memref<1x1xf32, #tpu.memory_space<vmem>>, %arg5: memref<1x1024xf32, #tpu.memory_space<vmem>>) attributes {dimension_semantics = [#tpu.dimension_semantics<arbitrary>, #tpu.dimension_semantics<arbitrary>], iteration_bounds = array<i64: 1, 1>, scalar_prefetch = 0 : i64, scratch_operands = 1 : i64, tpu.core_type = #tpu.core_type<tc>, window_params = [{transform_indices = @transform_0, window_bounds = array<i64: 1, 2, 1024>}, {transform_indices = @transform_1, window_bounds = array<i64: 1, 2, 1024>}, {pipeline_mode = #tpu.pipeline_mode<synchronous>, transform_indices = @transform_2, window_bounds = array<i64: 1, 1>}]} {
    %c0_i32 = arith.constant 0 : i32
    %0 = arith.cmpi eq, %arg0, %c0_i32 : i32
    %c0_i32_0 = arith.constant 0 : i32
    %1 = arith.cmpi eq, %arg1, %c0_i32_0 : i32
    %2 = arith.andi %0, %1 : i1
    %3 = arith.extui %2 : i1 to i32
    %c0_i32_1 = arith.constant 0 : i32
    %4 = arith.cmpi ne, %3, %c0_i32_1 : i32
    scf.if %4 {
      %cst_14 = arith.constant 0.000000e+00 : f32
      %22 = vector.broadcast %cst_14 : f32 to vector<1x1024xf32>
      %c0_15 = arith.constant 0 : index
      %c0_16 = arith.constant 0 : index
      %23 = vector.load %arg5[%c0_15, %c0_16] : memref<1x1024xf32, #tpu.memory_space<vmem>>, vector<1x1024xf32>
      tpu.vector_store %arg5[%c0_15, %c0_16], %22 {strides = array<i32>} : memref<1x1024xf32, #tpu.memory_space<vmem>>, vector<1x1024xf32>,
    } else {
    }
    %c0 = arith.constant 0 : index
    %c0_2 = arith.constant 0 : index
    %c0_3 = arith.constant 0 : index
    %5 = vector.load %arg2[%c0, %c0_2, %c0_3] : memref<1x2x1024xf32, #tpu.memory_space<vmem>>, vector<1x2x1024xf32>
    %6 = vector.shape_cast %5 : vector<1x2x1024xf32> to vector<2x1024xf32>
    %c0_4 = arith.constant 0 : index
    %c0_5 = arith.constant 0 : index
    %c0_6 = arith.constant 0 : index
    %7 = vector.load %arg3[%c0_4, %c0_5, %c0_6] : memref<1x2x1024xf32, #tpu.memory_space<vmem>>, vector<1x2x1024xf32>
    %8 = vector.shape_cast %7 : vector<1x2x1024xf32> to vector<2x1024xf32>
    %9 = arith.subf %6, %8 : vector<2x1024xf32>
    %10 = arith.mulf %9, %9 : vector<2x1024xf32>
    %cst = arith.constant dense<0.000000e+00> : vector<1024xf32>
    %11 = vector.multi_reduction <add>, %10, %cst [0] : vector<2x1024xf32> to vector<1024xf32>
    %12 = vector.shape_cast %11 : vector<1024xf32> to vector<1x1024xf32>
    %13 = math.sqrt %12 : vector<1x1024xf32>
    %c0_7 = arith.constant 0 : index
    %c0_8 = arith.constant 0 : index
    %14 = vector.load %arg5[%c0_7, %c0_8] : memref<1x1024xf32, #tpu.memory_space<vmem>>, vector<1x1024xf32>
    %15 = arith.addf %14, %13 : vector<1x1024xf32>
    %c0_9 = arith.constant 0 : index
    %c0_10 = arith.constant 0 : index
    %16 = vector.load %arg5[%c0_9, %c0_10] : memref<1x1024xf32, #tpu.memory_space<vmem>>, vector<1x1024xf32>
    tpu.vector_store %arg5[%c0_9, %c0_10], %15 {strides = array<i32>} : memref<1x1024xf32, #tpu.memory_space<vmem>>, vector<1x1024xf32>,
    %c0_i32_11 = arith.constant 0 : i32
    %17 = arith.cmpi eq, %arg0, %c0_i32_11 : i32
    %c0_i32_12 = arith.constant 0 : i32
    %18 = arith.cmpi eq, %arg1, %c0_i32_12 : i32
    %19 = arith.andi %17, %18 : i1
    %20 = arith.extui %19 : i1 to i32
    %c0_i32_13 = arith.constant 0 : i32
    %21 = arith.cmpi ne, %20, %c0_i32_13 : i32
    scf.if %21 {
      %c0_14 = arith.constant 0 : index
      %c0_15 = arith.constant 0 : index
      %22 = vector.load %arg5[%c0_14, %c0_15] : memref<1x1024xf32, #tpu.memory_space<vmem>>, vector<1x1024xf32>
      %cst_16 = arith.constant dense<0.000000e+00> : vector<1xf32>
      %23 = vector.multi_reduction <add>, %22, %cst_16 [1] : vector<1x1024xf32> to vector<1xf32>
      %24 = vector.shape_cast %23 : vector<1xf32> to vector<1x1xf32>
      %cst_17 = arith.constant 9.765625E-4 : f32
      %25 = vector.broadcast %cst_17 : f32 to vector<1x1xf32>
      %26 = arith.mulf %24, %25 : vector<1x1xf32>
      %c0_18 = arith.constant 0 : index
      %c0_19 = arith.constant 0 : index
      %27 = vector.load %arg4[%c0_18, %c0_19] : memref<1x1xf32, #tpu.memory_space<vmem>>, vector<1x1xf32>
      tpu.vector_store %arg4[%c0_18, %c0_19], %26 {strides = array<i32>} : memref<1x1xf32, #tpu.memory_space<vmem>>, vector<1x1xf32>,
    } else {
    }
    return
  }
  func.func @transform_0(%arg0: i32, %arg1: i32) -> (i32, i32, i32) {
    %c0_i32 = arith.constant 0 : i32
    %c0_i32_0 = arith.constant 0 : i32
    return %arg0, %c0_i32, %arg1 : i32, i32, i32
  }
  func.func @transform_1(%arg0: i32, %arg1: i32) -> (i32, i32, i32) {
    %c0_i32 = arith.constant 0 : i32
    %c0_i32_0 = arith.constant 0 : i32
    return %arg0, %c0_i32, %arg1 : i32, i32, i32
  }
  func.func @transform_2(%arg0: i32, %arg1: i32) -> (i32, i32) {
    %c0_i32 = arith.constant 0 : i32
    %c0_i32_0 = arith.constant 0 : i32
    %c0_i32_1 = arith.constant 0 : i32
    return %c0_i32, %c0_i32_0 : i32, i32
  }
}

</mosaic_0001>

<bundles_post_ra>
// kernel: tpu_custom_call.1
= control target key start
LH: loop header
LB: loop body
LE: loop exit
PB: predicated region body
PF: predicated region fallthrough
CT: control target
= control target key end

     0   :  { %7 = vsyncpa [#allocation4], 0  ;;  %s582_s0 = inlined_call_operand.hbm [shape: f32[1,2,1024], index: 0, kind: input, shape index: {}]   ;;  %s583_s1 = inlined_call_operand.hbm [shape: f32[1,2,1024], index: 1, kind: input, shape index: {}]   ;;  %s584_s2 = inlined_call_operand.hbm [shape: f32[1,1], index: 2, kind: output, shape index: {}]  }
   0x1   :  { %8 = vsyncpa [#allocation7], 0 }
   0x2   :  { %9 = vsyncpa [#allocation5], 0  ;;  %s15_s11 = sshll.u32 %s582_s0, 4  ;;  %s416_s12 = smov [#allocation3]   ;;  %s16_s11 = int_to_ptr.hbm [resolvable:$true] %s15_s11 }
   0x3   :  { %s17_s13 = sshll.u32 %s416_s12, 4  ;;  %s26_s16 = sshll.u32 %s583_s1, 4  ;;  %s18_s13 = int_to_ptr.vmem [resolvable:$true] %s17_s13  ;;  %s27_s16 = int_to_ptr.hbm [resolvable:$true] %s26_s16 }
   0x4   :  { %20 = dma.hbm_to_vmem [thread:$0]  %s16_s11, 256, %s18_s13, [#allocation4]  }
   0x5   :  { %s417_s17 = smov [#allocation6]  }
   0x6   :  { %s28_s18 = sshll.u32 %s417_s17, 4  ;;  %s29_s18 = int_to_ptr.vmem [resolvable:$true] %s28_s18 }
   0x7   :  { %31 = dma.hbm_to_vmem [thread:$0]  %s27_s16, 256, %s29_s18, [#allocation7]  }
   0x8   :  { %410 = dma.done.wait [#allocation4], 256  }
   0x9   :  { %411 = vsyncadd [#allocation4], 4294967040 }
   0xa   :  { %412 = dma.done.wait [#allocation7], 256  }
   0xb   :  { %413 = vsyncadd [#allocation7], 4294967040  ;;  %v47_v0 = vld [vmem:[#allocation3] sm:$0xff]  ;;  %v48_v1 = vld [vmem:[#allocation3 + $0x8] sm:$0xff]  ;;  %vm585_vm0 = vcmask 1041408   ;;  %vm247_vm13 = vcmask 1042434  }
   0xc   :  { %v49_v2 = vld [vmem:[#allocation6] sm:$0xff]  ;;  %v50_v3 = vld [vmem:[#allocation6 + $0x8] sm:$0xff]  ;;  %s418_s0 = smov [#allocation8]   ;;  %s308_s21 = sshll.u32 %s584_s2, 4  ;;  %s309_s21 = int_to_ptr.hbm [resolvable:$true] %s308_s21 }
   0xd   :  { %v51_v4 = vsub.f32 %v47_v0, %v49_v2  ;;  %v52_v5 = vsub.f32 %v48_v1, %v50_v3  ;;  %s306_s1 = sshll.u32 %s418_s0, 4  ;;  %s307_s1 = int_to_ptr.vmem [resolvable:$true] %s306_s1 }
   0xf   :  { %v53_v6 = vmul.f32 %v51_v4, %v51_v4  ;;  %v54_v7 = vmul.f32 %v52_v5, %v52_v5 }
  0x11   :  { %57 = vst [vmem:[#allocation1] ss:$4 sm:$0xff] %v53_v6 }
  0x12   :  { %59 = vst [vmem:[#allocation1 + $0x20] ss:$4 sm:$0xff] %v54_v7 }
  0x18   :  { %v60_v8 = vld.sshfl [vmem:[#allocation1] sm:$0xff pattern:$0x73625140]  ;;  %v61_v9 = vld.sshfl [vmem:[#allocation1 + $0x8] sm:$0xff pattern:$0x73625140] }
  0x19   :  { %v62_v10 = vld.sshfl [vmem:[#allocation1 + $0x10] sm:$0xff pattern:$0x73625140]  ;;  %v63_v11 = vld.sshfl [vmem:[#allocation1 + $0x18] sm:$0xff pattern:$0x73625140] }
  0x1a   :  { %v64_v12 = vld.sshfl [vmem:[#allocation1 + $0x20] sm:$0xff pattern:$0x73625140]  ;;  %v65_v13 = vld.sshfl [vmem:[#allocation1 + $0x28] sm:$0xff pattern:$0x73625140] }
  0x1b   :  { %v66_v14 = vld.sshfl [vmem:[#allocation1 + $0x30] sm:$0xff pattern:$0x73625140]  ;;  %v67_v15 = vld.sshfl [vmem:[#allocation1 + $0x38] sm:$0xff pattern:$0x73625140] }
  0x1c   :  { %v77_v16 = vsel %vm585_vm0, %v60_v8, 0.0  ;;  %v84_v17 = vsel %vm585_vm0, %v61_v9, 0.0  ;;  %v91_v18 = vsel %vm585_vm0, %v62_v10, 0.0  ;;  %v98_v19 = vsel %vm585_vm0, %v63_v11, 0.0 }
  0x1d   :  { %v78_v20 = vrot.slane %v77_v16, 4  ;;  %v85_v21 = vrot.slane %v84_v17, 4  ;;  %v92_v22 = vrot.slane %v91_v18, 4  ;;  %v99_v23 = vrot.slane %v98_v19, 4 }
  0x1e   :  { %v105_v24 = vsel %vm585_vm0, %v64_v12, 0.0  ;;  %v112_v25 = vsel %vm585_vm0, %v65_v13, 0.0  ;;  %v119_v26 = vsel %vm585_vm0, %v66_v14, 0.0  ;;  %v126_v27 = vsel %vm585_vm0, %v67_v15, 0.0 }
  0x1f   :  { %v79_v28 = vadd.f32 %v78_v20, %v77_v16  ;;  %v86_v29 = vadd.f32 %v85_v21, %v84_v17  ;;  %v93_v30 = vadd.f32 %v92_v22, %v91_v18  ;;  %v100_v31 = vadd.f32 %v99_v23, %v98_v19 }
  0x20   :  { %v106_v32 = vrot.slane %v105_v24, 4  ;;  %v113_v33 = vrot.slane %v112_v25, 4  ;;  %v120_v34 = vrot.slane %v119_v26, 4  ;;  %v127_v35 = vrot.slane %v126_v27, 4 }
  0x21   :  { %v80_v36 = vrot.slane %v79_v28, 2  ;;  %v87_v37 = vrot.slane %v86_v29, 2  ;;  %v94_v38 = vrot.slane %v93_v30, 2  ;;  %v101_v39 = vrot.slane %v100_v31, 2 }
  0x22   :  { %v107_v40 = vadd.f32 %v106_v32, %v105_v24  ;;  %v114_v41 = vadd.f32 %v113_v33, %v112_v25  ;;  %v121_v42 = vadd.f32 %v120_v34, %v119_v26  ;;  %v128_v43 = vadd.f32 %v127_v35, %v126_v27 }
  0x23   :  { %v81_v44 = vadd.f32 %v80_v36, %v79_v28  ;;  %v88_v45 = vadd.f32 %v87_v37, %v86_v29  ;;  %v95_v46 = vadd.f32 %v94_v38, %v93_v30  ;;  %v102_v47 = vadd.f32 %v101_v39, %v100_v31 }
  0x24   :  { %v108_v48 = vrot.slane %v107_v40, 2  ;;  %v115_v49 = vrot.slane %v114_v41, 2  ;;  %v122_v50 = vrot.slane %v121_v42, 2  ;;  %v129_v51 = vrot.slane %v128_v43, 2 }
  0x25   :  { %v82_v52 = vrot.slane %v81_v44, 1  ;;  %v89_v53 = vrot.slane %v88_v45, 1  ;;  %v96_v54 = vrot.slane %v95_v46, 1  ;;  %v103_v55 = vrot.slane %v102_v47, 1 }
  0x26   :  { %v109_v56 = vadd.f32 %v108_v48, %v107_v40  ;;  %v116_v57 = vadd.f32 %v115_v49, %v114_v41  ;;  %v123_v58 = vadd.f32 %v122_v50, %v121_v42  ;;  %v130_v59 = vadd.f32 %v129_v51, %v128_v43 }
  0x27   :  { %v448_v60 = vadd.f32 %v82_v52, %v81_v44  ;;  %v450_v61 = vadd.f32 %v89_v53, %v88_v45  ;;  %v452_v62 = vadd.f32 %v96_v54, %v95_v46  ;;  %v454_v2 = vadd.f32 %v103_v55, %v102_v47 }
  0x28   :  { %v110_v63 = vrot.slane %v109_v56, 1  ;;  %v117_v0 = vrot.slane %v116_v57, 1  ;;  %v124_v1 = vrot.slane %v123_v58, 1  ;;  %v131_v3 = vrot.slane %v130_v59, 1 }
  0x29   :  { %322 = vrsqrt.f32 %v448_v60  ;;  %vm140_vm1 = vcmp.eq.f32.partialorder %v448_v60, inf  ;;  %v143_v13 = vand.u32 2147483648, %v448_v60  ;;  %vm152_vm2 = vcmp.eq.f32.partialorder %v450_v61, inf }
  0x2a   :  { %v457_v4 = vadd.f32 %v110_v63, %v109_v56  ;;  %v459_v5 = vadd.f32 %v117_v0, %v116_v57  ;;  %324 = vrsqrt.f32 %v450_v61  ;;  %v462_v6 = vadd.f32 %v124_v1, %v123_v58 }
  0x2b   :  { %326 = vrsqrt.f32 %v452_v62  ;;  %v465_v7 = vadd.f32 %v131_v3, %v130_v59  ;;  %v155_v16 = vand.u32 2147483648, %v450_v61  ;;  %v167_v18 = vand.u32 2147483648, %v452_v62 }
  0x2c   :  { %328 = vrsqrt.f32 %v454_v2  ;;  %v179_v19 = vand.u32 2147483648, %v454_v2  ;;  %vm154_vm3 = vcmp.eq.f32.partialorder %v450_v61, 0.0  ;;  %vm164_vm4 = vcmp.eq.f32.partialorder %v452_v62, inf }
  0x2d   :  { %330 = vrsqrt.f32 %v457_v4  ;;  %v191_v24 = vand.u32 2147483648, %v457_v4  ;;  %vm166_vm5 = vcmp.eq.f32.partialorder %v452_v62, 0.0  ;;  %vm176_vm6 = vcmp.eq.f32.partialorder %v454_v2, inf }
  0x2e   :  { %332 = vrsqrt.f32 %v459_v5  ;;  %v203_v28 = vand.u32 2147483648, %v459_v5  ;;  %v215_v29 = vand.u32 2147483648, %v462_v6  ;;  %vm178_vm7 = vcmp.eq.f32.partialorder %v454_v2, 0.0 }
  0x2f   :  { %v323_v8 = vpop.eup %322  ;;  %334 = vrsqrt.f32 %v462_v6  ;;  %vm188_vm8 = vcmp.eq.f32.partialorder %v457_v4, inf  ;;  %vm190_vm9 = vcmp.eq.f32.partialorder %v457_v4, 0.0  ;;  %vm200_vm10 = vcmp.eq.f32.partialorder %v459_v5, inf }
  0x30   :  { %v134_v9 = vmul.f32 %v323_v8, %v448_v60  ;;  %v325_v10 = vpop.eup %324  ;;  %336 = vrsqrt.f32 %v465_v7  ;;  %v227_v39 = vand.u32 2147483648, %v465_v7  ;;  %vm142_vm11 = vcmp.eq.f32.partialorder %v448_v60, 0.0 }
  0x31   :  { %v327_v11 = vpop.eup %326  ;;  %v146_v14 = vmul.f32 %v325_v10, %v450_v61  ;;  %vm202_vm12 = vcmp.eq.f32.partialorder %v459_v5, 0.0  ;;  %vm224_vm15 = vcmp.eq.f32.partialorder %v465_v7, inf  ;;  %vm245_vm0 = vcmask 1040384  }
  0x32   :  { %v135_v12 = vmul.f32 %v323_v8, %v134_v9  ;;  %v329_v15 = vpop.eup %328  ;;  %v158_v17 = vmul.f32 %v327_v11, %v452_v62  ;;  %vm226_vm14 = vcmp.eq.f32.partialorder %v465_v7, 0.0 }
  0x33   :  { %v331_v20 = vpop.eup %330  ;;  %v147_v22 = vmul.f32 %v325_v10, %v146_v14  ;;  %v170_v23 = vmul.f32 %v329_v15, %v454_v2 }
  0x34   :  { %v136_v21 = vmul.f32 0.5, %v135_v12  ;;  %v333_v25 = vpop.eup %332  ;;  %v159_v26 = vmul.f32 %v327_v11, %v158_v17  ;;  %v182_v27 = vmul.f32 %v331_v20, %v457_v4 }
  0x35   :  { %v335_v30 = vpop.eup %334  ;;  %v148_v32 = vmul.f32 0.5, %v147_v22  ;;  %v171_v33 = vmul.f32 %v329_v15, %v170_v23  ;;  %v194_v34 = vmul.f32 %v333_v25, %v459_v5 }
  0x36   :  { %v137_v31 = vsub.f32 1.5, %v136_v21  ;;  %v337_v35 = vpop.eup %336  ;;  %v160_v36 = vmul.f32 0.5, %v159_v26  ;;  %v183_v37 = vmul.f32 %v331_v20, %v182_v27  ;;  %v206_v38 = vmul.f32 %v335_v30, %v462_v6 }
  0x37   :  { %v149_v41 = vsub.f32 1.5, %v148_v32  ;;  %v172_v42 = vmul.f32 0.5, %v171_v33  ;;  %v195_v43 = vmul.f32 %v333_v25, %v194_v34  ;;  %v218_v47 = vmul.f32 %v337_v35, %v465_v7 }
  0x38   :  { %v138_v40 = vmul.f32 %v323_v8, %v137_v31  ;;  %v161_v44 = vsub.f32 1.5, %v160_v36  ;;  %v184_v45 = vmul.f32 0.5, %v183_v37  ;;  %v207_v46 = vmul.f32 %v335_v30, %v206_v38 }
  0x39   :  { %v150_v49 = vmul.f32 %v325_v10, %v149_v41  ;;  %v173_v50 = vsub.f32 1.5, %v172_v42  ;;  %v196_v51 = vmul.f32 0.5, %v195_v43  ;;  %v219_v55 = vmul.f32 %v337_v35, %v218_v47 }
  0x3a   :  { %v139_v48 = vmul.f32 %v138_v40, %v448_v60  ;;  %v162_v52 = vmul.f32 %v327_v11, %v161_v44  ;;  %v185_v53 = vsub.f32 1.5, %v184_v45  ;;  %v208_v54 = vmul.f32 0.5, %v207_v46 }
  0x3b   :  { %v151_v56 = vmul.f32 %v150_v49, %v450_v61  ;;  %v174_v57 = vmul.f32 %v329_v15, %v173_v50  ;;  %v197_v58 = vsub.f32 1.5, %v196_v51  ;;  %v220_v10 = vmul.f32 0.5, %v219_v55 }
  0x3c   :  { %v141_v59 = vsel %vm140_vm1, %v448_v60, %v139_v48  ;;  %v163_v63 = vmul.f32 %v162_v52, %v452_v62  ;;  %v186_v0 = vmul.f32 %v331_v20, %v185_v53  ;;  %v209_v1 = vsub.f32 1.5, %v208_v54 }
  0x3d   :  { %v153_v3 = vsel %vm152_vm2, %v450_v61, %v151_v56  ;;  %v175_v8 = vmul.f32 %v174_v57, %v454_v2  ;;  %v198_v9 = vmul.f32 %v333_v25, %v197_v58  ;;  %v221_v61 = vsub.f32 1.5, %v220_v10 }
  0x3e   :  { %v156_v11 = vsel %vm154_vm3, %v155_v16, %v153_v3  ;;  %v165_v12 = vsel %vm164_vm4, %v452_v62, %v163_v63  ;;  %v187_v14 = vmul.f32 %v186_v0, %v457_v4  ;;  %v210_v15 = vmul.f32 %v335_v30, %v209_v1 }
  0x3f   :  { %v168_v17 = vsel %vm166_vm5, %v167_v18, %v165_v12  ;;  %v177_v20 = vsel %vm176_vm6, %v454_v2, %v175_v8  ;;  %v199_v21 = vmul.f32 %v198_v9, %v459_v5  ;;  %v238_v62 = vrot.slane %v156_v11, 7 }
  0x40   :  { %v180_v16 = vsel %vm178_vm7, %v179_v19, %v177_v20  ;;  %v189_v22 = vsel %vm188_vm8, %v457_v4, %v187_v14  ;;  %v211_v23 = vmul.f32 %v210_v15, %v462_v6  ;;  %v222_v26 = vmul.f32 %v337_v35, %v221_v61 }
  0x41   :  { %v192_v18 = vsel %vm190_vm9, %v191_v24, %v189_v22  ;;  %v201_v25 = vsel %vm200_vm10, %v459_v5, %v199_v21  ;;  %v239_v27 = vrot.slane %v168_v17, 6  ;;  %v144_v2 = vsel %vm142_vm11, %v143_v13, %v141_v59 }
  0x42   :  { %v204_v19 = vsel %vm202_vm12, %v203_v28, %v201_v25  ;;  %vm586_vm1 = vcmp.eq.f32.partialorder %v462_v6, inf  ;;  %v240_v24 = vrot.slane %v180_v16, 5  ;;  %vm587_vm2 = vcmp.eq.f32.partialorder %v462_v6, 0.0 }
  0x43   :  { %v213_v4 = vsel %vm586_vm1, %v462_v6, %v211_v23  ;;  %v223_v31 = vmul.f32 %v222_v26, %v465_v7  ;;  %v241_v32 = vrot.slane %v192_v18, 4  ;;  %v242_v60 = vrot.slane %v204_v19, 3 }
  0x44   :  { %v216_v30 = vsel %vm587_vm2, %v215_v29, %v213_v4  ;;  %vm250_vm3 = vcmask 1044484   ;;  %v246_v28 = vsel %vm245_vm0, %v144_v2, %v238_v62  ;;  %v248_v33 = vsel %vm247_vm13, %v239_v27, %v240_v24 }
  0x45   :  { %v225_v5 = vsel %vm224_vm15, %v465_v7, %v223_v31  ;;  %v243_v13 = vrot.slane %v216_v30, 2  ;;  %vm252_vm4 = vcmask 1046534   ;;  %v251_v34 = vsel %vm250_vm3, %v241_v32, %v242_v60 }
  0x46   :  { %v228_v6 = vsel %vm226_vm14, %v227_v39, %v225_v5  ;;  %vm254_vm5 = vcmask 1045508   ;;  %vm588_vm6 = vcmask 1041408   ;;  %vm256_vm7 = vcmask 1043456  }
  0x47   :  { %v244_v29 = vrot.slane %v228_v6, 1  ;;  %v249_v35 = vsel %vm588_vm6, %v246_v28, %v248_v33  ;;  %vm299_vm8 = vcmask 0  }
  0x49   :  { %v253_v36 = vsel %vm252_vm4, %v243_v13, %v244_v29 }
  0x4a   :  { %v255_v37 = vsel %vm254_vm5, %v251_v34, %v253_v36 }
  0x4b   :  { %v257_v38 = vsel %vm256_vm7, %v249_v35, %v255_v37 }
  0x4c   :  { %v265_v40 = vperm.slane %v257_v38, 0  ;;  %v266_v41 = vperm.slane %v257_v38, 1  ;;  %v267_v42 = vperm.slane %v257_v38, 2  ;;  %v268_v43 = vperm.slane %v257_v38, 3 }
  0x4d   :  { %v269_v44 = vperm.slane %v257_v38, 4  ;;  %v270_v47 = vperm.slane %v257_v38, 5  ;;  %v271_v50 = vperm.slane %v257_v38, 6  ;;  %v272_v53 = vperm.slane %v257_v38, 7 }
  0x4e   :  { %v281_v45 = vsel %vm245_vm0, %v265_v40, 0.0  ;;  %v282_v7 = vsel %vm245_vm0, %v266_v41, 0.0  ;;  %v284_v39 = vsel %vm245_vm0, %v267_v42, 0.0  ;;  %v286_v48 = vsel %vm245_vm0, %v268_v43, 0.0 }
  0x4f   :  { %v283_v46 = vadd.f32 %v282_v7, %v281_v45  ;;  %v288_v51 = vsel %vm245_vm0, %v269_v44, 0.0  ;;  %v290_v54 = vsel %vm245_vm0, %v270_v47, 0.0  ;;  %v292_v56 = vsel %vm245_vm0, %v271_v50, 0.0 }
  0x50   :  { %v294_v58 = vsel %vm245_vm0, %v272_v53, 0.0 }
  0x51   :  { %v285_v49 = vadd.f32 %v284_v39, %v283_v46 }
  0x53   :  { %v287_v52 = vadd.f32 %v286_v48, %v285_v49 }
  0x55   :  { %v289_v55 = vadd.f32 %v288_v51, %v287_v52 }
  0x57   :  { %v291_v57 = vadd.f32 %v290_v54, %v289_v55 }
  0x59   :  { %v293_v59 = vadd.f32 %v292_v56, %v291_v57 }
  0x5b   :  { %v295_v63 = vadd.f32 %v294_v58, %v293_v59 }
  0x5d   :  { %296 = vadd.xlane.f32.xlu0 %v295_v63 }
  0xd0   :  { %v297_v0 = vpop.xlane.xlu0 %296 }
  0xd1   :  { %v298_v1 = vmul.f32 0.0009765625, %v297_v0 }
  0xd3   :  { %300 = vst.msk [vmem:[#allocation8] sm:$0x1] %vm299_vm8, %v298_v1 }
  0xd4   :  { %311 = dma.vmem_to_hbm [thread:$0]  %s307_s1, 16, %s309_s21, [#allocation5]  }
  0xd5   :  { %414 = dma.done.wait [#allocation5], 16  }
  0xd6   :  { %415 = vsyncadd [#allocation5], 4294967280 }
  0xd7   :  { %316 = vsyncpa [#allocation4], 1 }
  0xd8   :  { %317 = vsyncpa [#allocation7], 1 }
  0xd9   :  { %318 = vsyncpa [#allocation5], 1 }

</bundles_post_ra>
